<compile_context>
chip_gen: v5e
topology: v5e:2x2
jax: 0.10.0
libtpu: 0.0.40
codegen_flags: <defaults>
</compile_context>

<pallas_src>
import functools
import math

import numpy as np
import jax
import jax.numpy as jnp
from jax import lax
from jax.experimental import pallas as pl
from jax.experimental.pallas import tpu as pltpu


# -----------------------------------------------------------------------------
# Helpers
# -----------------------------------------------------------------------------
def _round_up(v, m):
    return (v + m - 1) // m * m


def _pick_tm_lanes(M, K, itemsize, cap_bytes=10 << 20):
    """Largest multiple of 128 dividing M (preferred) under a byte cap for the
    (K, tm) input block; otherwise the cap itself (M gets zero padded)."""
    cap = max(128, (cap_bytes // max(1, K * itemsize)) // 128 * 128)
    if M % 128 == 0:
        t = min(cap, M)
        while t >= 128:
            if M % t == 0:
                return t, M
            t -= 128
    tm = min(cap, _round_up(M, 128))
    return tm, _round_up(M, tm)


# -----------------------------------------------------------------------------
# Lane-dense Pallas matmul (+bias, optional ReLU): out = act(W @ X + b)
#   W: (N, K)   X: (K, M)   b: (N,)   out: (N, M) f32
# M (the pixel axis) sits on the 128-lane axis, so with N = 16/32/64 the
# output stores stay unmasked (lane dense) instead of vst.msk partial stores.
# -----------------------------------------------------------------------------
def _matmul_T_kernel(w_ref, x_ref, b_ref, o_ref, *, relu):
    r = jnp.dot(w_ref[...], x_ref[...],
                preferred_element_type=jnp.float32) + b_ref[...]
    if relu:
        r = jnp.maximum(r, 0.0)
    o_ref[...] = r


def pallas_matmul_T(w, x, b, *, relu, compute_dtype=jnp.bfloat16):
    N, K = w.shape
    K2, M = x.shape
    assert K2 == K
    itemsize = np.dtype(compute_dtype).itemsize
    tm, Mp = _pick_tm_lanes(M, K, itemsize)
    if Mp != M:
        x = jnp.pad(x, ((0, 0), (0, Mp - M)))
    x = x.astype(compute_dtype)
    w = w.astype(compute_dtype)
    b2 = b.reshape(N, 1).astype(jnp.float32)
    # right-sized scoped VMEM: double-buffered X/out blocks + weights + margin
    vmem_limit = int(2 * (K * tm * itemsize + N * tm * 4)
                     + 2 * N * K * itemsize + (12 << 20))
    out = pl.pallas_call(
        functools.partial(_matmul_T_kernel, relu=relu),
        out_shape=jax.ShapeDtypeStruct((N, Mp), jnp.float32),
        grid_spec=pltpu.PrefetchScalarGridSpec(
            num_scalar_prefetch=0,
            grid=(Mp // tm,),
            in_specs=[
                pl.BlockSpec((N, K), lambda j: (0, 0)),
                pl.BlockSpec((K, tm), lambda j: (0, j)),
                pl.BlockSpec((N, 1), lambda j: (0, 0)),
            ],
            out_specs=pl.BlockSpec((N, tm), lambda j: (0, j)),
        ),
        compiler_params=pltpu.CompilerParams(
            dimension_semantics=("parallel",),
            vmem_limit_bytes=vmem_limit),
    )(w, x, b2)
    return out[:, :M] if Mp != M else out


# -----------------------------------------------------------------------------
# Conv stages: Conv3d(k=5) -> AvgPool3d(2,2) -> ReLU, folded to a stride-2 k=6
# conv (exact), im2col (transposed layout) + Pallas matmul.
# -----------------------------------------------------------------------------
def fold_pool_into_conv_T(w5):
    """conv5 -> avgpool2 == conv6(stride 2) with box-filtered weights (exact).
    Returns (Cout, K) with K ordered (kd, kh, kw, cin)."""
    w5 = np.asarray(w5, np.float32)
    cout, cin = w5.shape[:2]
    w6 = np.zeros((cout, cin, 6, 6, 6), np.float32)
    for ed in (0, 1):
        for eh in (0, 1):
            for ew in (0, 1):
                w6[:, :, ed:ed + 5, eh:eh + 5, ew:ew + 5] += w5
    w6 *= 0.125
    return jnp.asarray(np.transpose(w6, (0, 2, 3, 4, 1)).reshape(cout, 216 * cin))


def extract_patches_T(a, k, s):
    """a: (C, B, D, H, W) -> (k^3*C, B*Do*Ho*Wo); rows ordered (kd, kh, kw, c),
    columns ordered (b, od, oh, ow) so the matmul output is directly the next
    stage's (Cout, B, Do, Ho, Wo) activation (no XLA transposes needed)."""
    C, B, D, H, W = a.shape
    Do = (D - k) // s + 1
    Ho = (H - k) // s + 1
    Wo = (W - k) // s + 1
    slices = []
    for kd in range(k):
        for kh in range(k):
            for kw in range(k):
                slices.append(a[:, :, kd:kd + s * (Do - 1) + 1:s,
                                kh:kh + s * (Ho - 1) + 1:s,
                                kw:kw + s * (Wo - 1) + 1:s])
    p = jnp.stack(slices, axis=0)                # (k^3, C, B, Do, Ho, Wo)
    return p.reshape(k * k * k * C, B * Do * Ho * Wo), (Do, Ho, Wo)


def conv_pool_relu_stage_T(a, w_lhs, bias, *, compute_dtype=jnp.bfloat16):
    """a: (Cin, B, D, H, W) -> (Cout, B, Do, Ho, Wo)."""
    # TODO(synk): fuse the im2col into the matmul kernel (activations are small
    #             enough to stay VMEM resident) to drop the patch HBM round trip.
    B = a.shape[1]
    patches, (Do, Ho, Wo) = extract_patches_T(a.astype(compute_dtype), 6, 2)
    out = pallas_matmul_T(w_lhs, patches, bias, relu=True,
                          compute_dtype=compute_dtype)
    return out.reshape(w_lhs.shape[0], B, Do, Ho, Wo)


# -----------------------------------------------------------------------------
# Fused FC (Linear 4096->32 + ReLU) + translation/rotation heads: one call.
# -----------------------------------------------------------------------------
def _fc_head_kernel(x_ref, w1_ref, b1_ref, w2_ref, b2_ref, o_ref):
    feat = jnp.dot(x_ref[...], w1_ref[...],
                   preferred_element_type=jnp.float32) + b1_ref[...]
    feat = jnp.maximum(feat, 0.0)
    o_ref[...] = jnp.dot(feat, w2_ref[...],
                         preferred_element_type=jnp.float32) + b2_ref[...]


def fc_head_pallas(x, fc_w, fc_b, w_t, b_t, w_r, b_r):
    """head = relu(x @ fc_w + fc_b) @ [w_t | w_r] + [b_t | b_r]  -> (B, 6)."""
    B, K = x.shape
    N1 = fc_w.shape[1]
    w2 = jnp.concatenate([w_t, w_r], axis=1).astype(jnp.float32)   # (32, 6)
    b2 = jnp.concatenate([b_t, b_r], axis=0).reshape(1, -1).astype(jnp.float32)
    N2 = w2.shape[1]
    Bp = _round_up(B, 8)
    if Bp != B:
        x = jnp.pad(x, ((0, Bp - B), (0, 0)))
    out = pl.pallas_call(
        _fc_head_kernel,
        out_shape=jax.ShapeDtypeStruct((Bp, N2), jnp.float32),
        grid_spec=pltpu.PrefetchScalarGridSpec(
            num_scalar_prefetch=0,
            grid=(1,),   # tiny tail kernel; single step is fine even on v7x
            in_specs=[
                pl.BlockSpec((Bp, K), lambda i: (0, 0)),
                pl.BlockSpec((K, N1), lambda i: (0, 0)),
                pl.BlockSpec((1, N1), lambda i: (0, 0)),
                pl.BlockSpec((N1, N2), lambda i: (0, 0)),
                pl.BlockSpec((1, N2), lambda i: (0, 0)),
            ],
            out_specs=pl.BlockSpec((Bp, N2), lambda i: (0, 0)),
        ),
    )(x.astype(jnp.bfloat16), fc_w.astype(jnp.bfloat16),
      fc_b.reshape(1, -1).astype(jnp.float32), w2, b2)
    return out[:B]


# -----------------------------------------------------------------------------
# affine_matrix (tiny per-batch 4x4 algebra, JAX glue -- matches PyTorch)
# -----------------------------------------------------------------------------
def affine_matrix(trans_lin, rot_lin):
    t = jnp.tanh(trans_lin) * 0.5
    r = jnp.tanh(rot_lin) * (math.pi / 4.0)
    b = trans_lin.shape[0]
    z = jnp.zeros((b,), jnp.float32)
    o = jnp.ones((b,), jnp.float32)
    c1, s1 = jnp.cos(r[:, 0]), jnp.sin(r[:, 0])
    c2, s2 = jnp.cos(r[:, 1]), jnp.sin(r[:, 1])
    c3, s3 = jnp.cos(r[:, 2]), jnp.sin(r[:, 2])

    def mat(rows):
        return jnp.stack([jnp.stack(row, axis=-1) for row in rows], axis=-2)

    T = mat([[o, z, z, t[:, 0]], [z, o, z, t[:, 1]],
             [z, z, o, t[:, 2]], [z, z, z, o]])
    R1 = mat([[c1, -s1, z, z], [s1, c1, z, z], [z, z, o, z], [z, z, z, o]])
    R2 = mat([[o, z, z, z], [z, c2, -s2, z], [z, s2, c2, z], [z, z, z, o]])
    R3 = mat([[c3, z, s3, z], [z, o, z, z], [-s3, z, c3, z], [z, z, z, o]])
    R = jnp.einsum('bij,bjk->bik', jnp.einsum('bij,bjk->bik', R1, R2), R3)
    M = jnp.einsum('bij,bjk->bik', T, R)
    return M[:, 0:3, :]


# -----------------------------------------------------------------------------
# XLA reference / fallback implementations of affine_grid + grid_sample
# -----------------------------------------------------------------------------
def _affine_grid_jax(theta, size):
    """F.affine_grid (5-D, align_corners=False)."""
    B, _, D, H, W = size
    xs = (2.0 * jnp.arange(W, dtype=jnp.float32) + 1.0) / W - 1.0
    ys = (2.0 * jnp.arange(H, dtype=jnp.float32) + 1.0) / H - 1.0
    zs = (2.0 * jnp.arange(D, dtype=jnp.float32) + 1.0) / D - 1.0
    zz, yy, xx = jnp.meshgrid(zs, ys, xs, indexing="ij")
    base = jnp.stack([xx, yy, zz, jnp.ones_like(xx)], axis=0).reshape(4, -1)
    g = jnp.einsum("bij,jk->bik", theta.astype(jnp.float32), base,
                   precision=lax.Precision.HIGHEST)
    return jnp.transpose(g, (0, 2, 1)).reshape(B, D, H, W, 3)


def _grid_sample_jax(img, grid):
    """F.grid_sample (5-D, bilinear, zeros padding, align_corners=False)."""
    B, C, D, H, W = img.shape
    x = grid[..., 0]
    y = grid[..., 1]
    z = grid[..., 2]
    ix = ((x + 1.0) * W - 1.0) / 2.0
    iy = ((y + 1.0) * H - 1.0) / 2.0
    iz = ((z + 1.0) * D - 1.0) / 2.0
    ix0, iy0, iz0 = jnp.floor(ix), jnp.floor(iy), jnp.floor(iz)
    tx, ty, tz = ix - ix0, iy - iy0, iz - iz0
    imgT = jnp.transpose(img, (0, 2, 3, 4, 1))
    bidx = jnp.arange(B).reshape(B, 1, 1, 1)
    out = jnp.zeros(grid.shape[:4] + (C,), jnp.float32)
    for dz in (0, 1):
        for dy in (0, 1):
            for dx in (0, 1):
                cx = ix0 + dx
                cy = iy0 + dy
                cz = iz0 + dz
                w = ((tx if dx else 1.0 - tx) *
                     (ty if dy else 1.0 - ty) *
                     (tz if dz else 1.0 - tz))
                valid = ((cx >= 0) & (cx <= W - 1) & (cy >= 0) &
                         (cy <= H - 1) & (cz >= 0) & (cz <= D - 1))
                cxi = jnp.clip(cx, 0, W - 1).astype(jnp.int32)
                cyi = jnp.clip(cy, 0, H - 1).astype(jnp.int32)
                czi = jnp.clip(cz, 0, D - 1).astype(jnp.int32)
                vals = imgT[bidx, czi, cyi, cxi]
                out = out + jnp.where(valid[..., None], vals, 0.0) * w[..., None]
    return jnp.transpose(out, (0, 4, 1, 2, 3))


# -----------------------------------------------------------------------------
# Fused Pallas warp kernel: affine_grid + trilinear grid_sample in one call.
#   - theta via scalar prefetch (SMEM); coordinates rebuilt from iota in-kernel
#   - moving volume zero padded (z/y by 1, x by 2), bf16, x-neighbour pairs
#     packed into one 32-bit word -> 4 gathers per output voxel, no masks.
# -----------------------------------------------------------------------------
def _pack_volume(mov):
    """mov: (B, 1, D, H, W) f32 -> (B, 1, (D+2)*(H+2)*(W+4)) f32-bitcast words
    where word[z, y, x] packs (bf16(v[x]), bf16(v[x+1])) of the padded volume."""
    v = mov[:, 0]
    vp = jnp.pad(v, ((0, 0), (1, 1), (1, 1), (2, 2)))        # zeros padding
    u = lax.bitcast_convert_type(vp.astype(jnp.bfloat16),
                                 jnp.uint16).astype(jnp.uint32)
    nxt = jnp.concatenate([u[..., 1:], jnp.zeros_like(u[..., :1])], axis=-1)
    packed = u | (nxt << 16)
    packed = lax.bitcast_convert_type(packed, jnp.float32)
    return packed.reshape(v.shape[0], 1, -1)


def _warp_kernel(theta_ref, vol_ref, wrp_ref, grid_ref, *, Dc, D, H, W, Hp, Wp):
    b = pl.program_id(0)
    HW = H * W
    fW, fH, fD = float(W), float(H), float(D)

    d0 = (pl.program_id(1) * Dc).astype(jnp.float32)
    dd = lax.broadcasted_iota(jnp.int32, (Dc, HW), 0).astype(jnp.float32) + d0
    hw = lax.broadcasted_iota(jnp.int32, (Dc, HW), 1).astype(jnp.float32)
    h_i = jnp.floor((hw + 0.5) / fW)            # +0.5 keeps floor exact in f32
    w_i = hw - h_i * fW
    xg = (2.0 * w_i + 1.0) / fW - 1.0
    yg = (2.0 * h_i + 1.0) / fH - 1.0
    zg = (2.0 * dd + 1.0) / fD - 1.0

    t = [theta_ref[b, j] for j in range(12)]
    gx = t[0] * xg + t[1] * yg + t[2] * zg + t[3]
    gy = t[4] * xg + t[5] * yg + t[6] * zg + t[7]
    gz = t[8] * xg + t[9] * yg + t[10] * zg + t[11]
    grid_ref[0, 0, :, :] = gx
    grid_ref[0, 1, :, :] = gy
    grid_ref[0, 2, :, :] = gz

    # un-normalize (align_corners=False)
    ix = (gx + 1.0) * (0.5 * fW) - 0.5
    iy = (gy + 1.0) * (0.5 * fH) - 0.5
    iz = (gz + 1.0) * (0.5 * fD) - 0.5
    ix0 = jnp.floor(ix)
    iy0 = jnp.floor(iy)
    iz0 = jnp.floor(iz)
    tx = ix - ix0
    ty = iy - iy0
    tz = iz - iz0
    # padded base indices: clamped corners land on zero voxels -> no masks
    cx = jnp.clip(ix0, -2.0, fW) + 2.0           # x padded by 2 (pairs packed)
    cy0 = jnp.clip(iy0, -1.0, fH) + 1.0
    cy1 = jnp.clip(iy0 + 1.0, -1.0, fH) + 1.0
    cz0 = jnp.clip(iz0, -1.0, fD) + 1.0
    cz1 = jnp.clip(iz0 + 1.0, -1.0, fD) + 1.0

    vol = vol_ref[0, 0, :]                       # packed (bf16, bf16) pairs
    acc = jnp.zeros((Dc, HW), jnp.float32)
    for dz in (0, 1):
        czp = cz1 if dz else cz0
        wz = tz if dz else (1.0 - tz)
        for dy in (0, 1):
            cyp = cy1 if dy else cy0
            wzy = wz * (ty if dy else (1.0 - ty))
            idx = (czp * float(Hp * Wp) + cyp * float(Wp) + cx).astype(jnp.int32)
            pair = pltpu.bitcast(jnp.take(vol, idx, axis=0, mode="clip"),
                                 jnp.uint32)
            v0 = pltpu.bitcast(jnp.left_shift(pair, jnp.uint32(16)),
                               jnp.float32)
            v1 = pltpu.bitcast(jnp.bitwise_and(pair, jnp.uint32(0xFFFF0000)),
                               jnp.float32)
            acc = acc + wzy * (v0 + tx * (v1 - v0))
    wrp_ref[0, :, :] = acc


def _warp_pallas(mov, theta):
    """mov: (B, 1, D, H, W) f32; theta: (B, 3, 4) -> (warped, grid)."""
    B, C, D, H, W = mov.shape
    HW = H * W
    Np = (D + 2) * (H + 2) * (W + 4)
    Dc = 16
    Dout = _round_up(D, Dc)          # pad depth so the block depth is tileable
    packed = _pack_volume(mov)
    theta_flat = theta.reshape(B, 12).astype(jnp.float32)
    wrp_r, grid_r = pl.pallas_call(
        functools.partial(_warp_kernel, Dc=Dc, D=D, H=H, W=W,
                          Hp=H + 2, Wp=W + 4),
        out_shape=(jax.ShapeDtypeStruct((B, Dout, HW), jnp.float32),
                   jax.ShapeDtypeStruct((B, 3, Dout, HW), jnp.float32)),
        grid_spec=pltpu.PrefetchScalarGridSpec(
            num_scalar_prefetch=1,
            grid=(B, Dout // Dc),
            in_specs=[pl.BlockSpec((1, 1, Np), lambda b, dblk, th: (b, 0, 0))],
            out_specs=[
                pl.BlockSpec((1, Dc, HW), lambda b, dblk, th: (b, dblk, 0)),
                pl.BlockSpec((1, 3, Dc, HW), lambda b, dblk, th: (b, 0, dblk, 0)),
            ],
        ),
        compiler_params=pltpu.CompilerParams(
            dimension_semantics=("parallel", "parallel"),
            vmem_limit_bytes=28 * 1024 * 1024),
    )(theta_flat, packed)
    wrp = wrp_r[:, :D].reshape(B, 1, D, H, W)
    grid = jnp.transpose(grid_r[:, :, :D].reshape(B, 3, D, H, W),
                         (0, 2, 3, 4, 1))
    return wrp, grid


_WARP_PATH_CACHE = {}


def warp_path_is_pallas(B, D, H, W):
    """One-time probe: run the fused Pallas warp kernel at the real shapes and
    validate it against the XLA reference; prints which path is used."""
    key = (B, D, H, W)
    if key not in _WARP_PATH_CACHE:
        ok = False
        try:
            k1, k2 = jax.random.split(jax.random.PRNGKey(7))
            img = jax.random.normal(k1, (B, 1, D, H, W), jnp.float32)
            eye = jnp.broadcast_to(
                jnp.array([[1., 0., 0., 0.], [0., 1., 0., 0.],
                           [0., 0., 1., 0.]], jnp.float32), (B, 3, 4))
            theta = eye + jax.random.uniform(k2, (B, 3, 4), jnp.float32,
                                             -0.2, 0.2)
            wrp_p, grid_p = _warp_pallas(img, theta)
            grid_ref = _affine_grid_jax(theta, img.shape)
            wrp_ref = _grid_sample_jax(img, grid_ref)
            wrp_p, grid_p, wrp_ref, grid_ref = jax.block_until_ready(
                (wrp_p, grid_p, wrp_ref, grid_ref))
            ok = (np.allclose(np.asarray(grid_p), np.asarray(grid_ref),
                              atol=1e-4) and
                  np.allclose(np.asarray(wrp_p), np.asarray(wrp_ref),
                              atol=5e-2))
        except Exception:
            ok = False
        _WARP_PATH_CACHE[key] = ok
        print("grid_sample_path:", "pallas" if ok else "xla_fallback")
    return _WARP_PATH_CACHE[key]


def warp_image(mov, theta):
    B, C, D, H, W = mov.shape
    if C == 1 and warp_path_is_pallas(B, D, H, W):
        return _warp_pallas(mov, theta)
    # TODO(synk): XLA fallback used only when the Mosaic in-kernel gather
    #             (jnp.take) lowering is unavailable at these shapes.
    grid = _affine_grid_jax(theta, mov.shape)
    return _grid_sample_jax(mov, grid), grid


# -----------------------------------------------------------------------------
# Parameter init (deterministic, shapes from registerNet.__init__)
# -----------------------------------------------------------------------------
def init_params(key, input_nc):
    ks = jax.random.split(key, 4)

    def conv_p(k, cout, cin, ksz):
        kw, kb = jax.random.split(k)
        bound = 1.0 / math.sqrt(cin * ksz ** 3)
        w = jax.random.uniform(kw, (cout, cin, ksz, ksz, ksz), jnp.float32,
                               -bound, bound)
        bb = jax.random.uniform(kb, (cout,), jnp.float32, -bound, bound)
        return w, bb

    def lin_p(k, nout, nin):
        kw, kb = jax.random.split(k)
        bound = 1.0 / math.sqrt(nin)
        w = jax.random.uniform(kw, (nout, nin), jnp.float32, -bound, bound)
        bb = jax.random.uniform(kb, (nout,), jnp.float32, -bound, bound)
        return w, bb

    w1, b1 = conv_p(ks[0], 16, input_nc, 5)
    w2, b2 = conv_p(ks[1], 32, 16, 5)
    w3, b3 = conv_p(ks[2], 64, 32, 5)
    fc_w, fc_b = lin_p(ks[3], 32, 64 * 4 * 4 * 4)
    return {
        'conv1': (fold_pool_into_conv_T(w1), b1),
        'conv2': (fold_pool_into_conv_T(w2), b2),
        'conv3': (fold_pool_into_conv_T(w3), b3),
        'fc': (fc_w.T, fc_b),                               # (in, out)
        'translation': (jnp.zeros((32, 3), jnp.float32),    # zero-init heads
                        jnp.zeros((3,), jnp.float32)),
        'rotation': (jnp.zeros((32, 3), jnp.float32),
                     jnp.zeros((3,), jnp.float32)),
    }


# -----------------------------------------------------------------------------
# Forward pass (registerNeter.forward == registerNet.forward, non-128 branch)
# -----------------------------------------------------------------------------
def register_neter_forward(params, x):
    """x: (B, C, D, H, W) float32, input_size=[60, 60, 60]."""
    B = x.shape[0]
    a = jnp.transpose(x, (1, 0, 2, 3, 4))                   # (C, B, D, H, W)
    for name in ('conv1', 'conv2', 'conv3'):
        w_lhs, bias = params[name]
        a = conv_pool_relu_stage_T(a, w_lhs, bias)
    # flatten in PyTorch NCDHW order to match nn.Linear(64*4*4*4, 32)
    feat_in = jnp.transpose(a, (1, 0, 2, 3, 4)).reshape(B, -1)
    head = fc_head_pallas(feat_in, params['fc'][0], params['fc'][1],
                          params['translation'][0], params['translation'][1],
                          params['rotation'][0], params['rotation'][1])
    theta = affine_matrix(head[:, 0:3], head[:, 3:6])       # (B, 3, 4)
    mov = x[:, 0:1]                                         # narrow(dim=1,0,1)
    return warp_image(mov, theta)


# -----------------------------------------------------------------------------
# Layout / pool-folding self check (small f32 problem vs XLA Conv3d + AvgPool)
# -----------------------------------------------------------------------------
def _self_check_conv_stage():
    kx, kw, kb = jax.random.split(jax.random.PRNGKey(42), 3)
    B, Cin, Dm, Cout = 1, 3, 12, 8
    x = jax.random.normal(kx, (B, Cin, Dm, Dm, Dm), jnp.float32)
    w5 = jax.random.normal(kw, (Cout, Cin, 5, 5, 5), jnp.float32) * 0.1
    bias = jax.random.normal(kb, (Cout,), jnp.float32) * 0.1
    got = conv_pool_relu_stage_T(jnp.transpose(x, (1, 0, 2, 3, 4)),
                                 fold_pool_into_conv_T(w5), bias,
                                 compute_dtype=jnp.float32)
    got = jnp.transpose(got, (1, 0, 2, 3, 4))
    ref = lax.conv_general_dilated(
        x, w5, (1, 1, 1), 'VALID',
        dimension_numbers=('NCDHW', 'OIDHW', 'NCDHW'),
        precision=lax.Precision.HIGHEST) + bias.reshape(1, -1, 1, 1, 1)
    ref = lax.reduce_window(ref, 0.0, lax.add,
                            (1, 1, 2, 2, 2), (1, 1, 2, 2, 2), 'VALID') * 0.125
    ref = jnp.maximum(ref, 0.0)
    np.testing.assert_allclose(np.asarray(got), np.asarray(ref),
                               atol=5e-2, rtol=5e-2)


# -----------------------------------------------------------------------------
if __name__ == "__main__":
    key = jax.random.PRNGKey(0)
    k_params, k_x = jax.random.split(key)

    input_nc = 2
    input_size = [60, 60, 60]   # smallest size consistent with Linear(64*4*4*4, 32)
    B = 2

    # small f32 layout/folding check + one-time probe for the fused warp kernel
    _self_check_conv_stage()
    warp_path_is_pallas(B, *input_size)

    params = init_params(k_params, input_nc)
    x = jax.random.normal(k_x, (B, input_nc) + tuple(input_size), jnp.float32)

    fwd = jax.jit(register_neter_forward)
    wrp, grid = fwd(params, x)
    jax.block_until_ready((wrp, grid))

    assert wrp.shape == (B, 1, 60, 60, 60) and wrp.dtype == jnp.float32
    assert grid.shape == (B, 60, 60, 60, 3) and grid.dtype == jnp.float32

    # zero-initialized heads -> identity theta: the warp must reproduce channel
    # 0 of the input (up to bf16 voxel storage in the sampler) and the returned
    # grid must be the identity affine grid.
    assert np.allclose(np.asarray(wrp), np.asarray(x[:, 0:1]), atol=3e-2)
    eye = jnp.broadcast_to(
        jnp.array([[1., 0., 0., 0.], [0., 1., 0., 0.], [0., 0., 1., 0.]],
                  jnp.float32), (B, 3, 4))
    ref_grid = _affine_grid_jax(eye, (B, 1) + tuple(input_size))
    assert np.allclose(np.asarray(grid), np.asarray(ref_grid), atol=1e-5)

    print("KERNEL_OK")
</pallas_src>

<mosaic_0001>
module attributes {stable_mosaic.version = 11 : i64} {
  func.func @_matmul_T_kernel(%arg0: i32, %arg1: memref<8x648xf32, #tpu.memory_space<vmem>>, %arg2: memref<648x128xf32, #tpu.memory_space<vmem>>, %arg3: memref<8x1xf32, #tpu.memory_space<vmem>>, %arg4: memref<8x128xf32, #tpu.memory_space<vmem>>) attributes {dimension_semantics = [#tpu.dimension_semantics<parallel>], iteration_bounds = array<i64: 1>, scalar_prefetch = 0 : i64, scratch_operands = 0 : i64, tpu.core_type = #tpu.core_type<tc>, window_params = [{pipeline_mode = #tpu.pipeline_mode<synchronous>, transform_indices = @transform_0, window_bounds = array<i64: 8, 648>}, {transform_indices = @transform_1, window_bounds = array<i64: 648, 128>}, {pipeline_mode = #tpu.pipeline_mode<synchronous>, transform_indices = @transform_2, window_bounds = array<i64: 8, 1>}, {transform_indices = @transform_3, window_bounds = array<i64: 8, 128>}]} {
    %c0 = arith.constant 0 : index
    %c0_0 = arith.constant 0 : index
    %0 = vector.load %arg1[%c0, %c0_0] : memref<8x648xf32, #tpu.memory_space<vmem>>, vector<8x648xf32>
    %c0_1 = arith.constant 0 : index
    %c0_2 = arith.constant 0 : index
    %1 = vector.load %arg2[%c0_1, %c0_2] : memref<648x128xf32, #tpu.memory_space<vmem>>, vector<648x128xf32>
    %cst = arith.constant dense<0.000000e+00> : vector<8x128xf32>
    %2 = tpu.matmul %0, %1, %cst {dimension_numbers = #tpu.dot_dimension_numbers<[1], [0], [0], [1], [0, 0, 1, 1], [], []>} : vector<8x648xf32>, vector<648x128xf32>, vector<8x128xf32> -> vector<8x128xf32>
    %c0_3 = arith.constant 0 : index
    %c0_4 = arith.constant 0 : index
    %3 = vector.load %arg3[%c0_3, %c0_4] : memref<8x1xf32, #tpu.memory_space<vmem>>, vector<8x1xf32>
    %4 = vector.broadcast %3 : vector<8x1xf32> to vector<8x128xf32>
    %5 = arith.addf %2, %4 : vector<8x128xf32>
    %cst_5 = arith.constant 0.000000e+00 : f32
    %6 = vector.broadcast %cst_5 : f32 to vector<8x128xf32>
    %7 = arith.maximumf %5, %6 : vector<8x128xf32>
    %c0_6 = arith.constant 0 : index
    %c0_7 = arith.constant 0 : index
    %8 = vector.load %arg4[%c0_6, %c0_7] : memref<8x128xf32, #tpu.memory_space<vmem>>, vector<8x128xf32>
    tpu.vector_store %arg4[%c0_6, %c0_7], %7 {strides = array<i32>} : memref<8x128xf32, #tpu.memory_space<vmem>>, vector<8x128xf32>,
    return
  }
  func.func @transform_0(%arg0: i32) -> (i32, i32) {
    %c0_i32 = arith.constant 0 : i32
    %c0_i32_0 = arith.constant 0 : i32
    %c0_i32_1 = arith.constant 0 : i32
    return %c0_i32, %c0_i32_0 : i32, i32
  }
  func.func @transform_1(%arg0: i32) -> (i32, i32) {
    %c0_i32 = arith.constant 0 : i32
    %c0_i32_0 = arith.constant 0 : i32
    return %c0_i32, %arg0 : i32, i32
  }
  func.func @transform_2(%arg0: i32) -> (i32, i32) {
    %c0_i32 = arith.constant 0 : i32
    %c0_i32_0 = arith.constant 0 : i32
    %c0_i32_1 = arith.constant 0 : i32
    return %c0_i32, %c0_i32_0 : i32, i32
  }
  func.func @transform_3(%arg0: i32) -> (i32, i32) {
    %c0_i32 = arith.constant 0 : i32
    %c0_i32_0 = arith.constant 0 : i32
    return %c0_i32, %arg0 : i32, i32
  }
}

</mosaic_0001>

<bundles_post_ra>
// kernel: tpu_custom_call.1
= control target key start
LH: loop header
LB: loop body
LE: loop exit
PB: predicated region body
PF: predicated region fallthrough
CT: control target
= control target key end

     0   :  { %8 = vsyncpa [#allocation3], 0  ;;  %s406_s0 = inlined_call_operand.hbm [shape: f32[8,648], index: 0, kind: input, shape index: {}]   ;;  %s407_s1 = inlined_call_operand.hbm [shape: f32[648,128], index: 1, kind: input, shape index: {}]   ;;  %s408_s2 = inlined_call_operand.vmem [shape: f32[8,1], index: 2, kind: input, shape index: {}]   ;;  %s409_s3 = inlined_call_operand.hbm [shape: f32[8,128], index: 3, kind: output, shape index: {}]  }
   0x1   :  { %9 = vsyncpa [#allocation6], 0 }
   0x2   :  { %10 = vsyncpa [#allocation4], 0  ;;  %s16_s14 = sshll.u32 %s406_s0, 4  ;;  %s368_s15 = smov [#allocation2]   ;;  %s17_s14 = int_to_ptr.hbm [resolvable:$true] %s16_s14 }
   0x3   :  { %s18_s16 = sshll.u32 %s368_s15, 4  ;;  %s26_s19 = sshll.u32 %s407_s1, 4  ;;  %s19_s16 = int_to_ptr.vmem [resolvable:$true] %s18_s16  ;;  %s27_s19 = int_to_ptr.hbm [resolvable:$true] %s26_s19 }
   0x4   :  { %21 = dma.hbm_to_vmem [thread:$0]  %s17_s14, 768, %s19_s16, [#allocation3]  }
   0x5   :  { %s369_s20 = smov [#allocation5]   ;;  %s370_s22 = smov 128  }
   0x6   :  { %s28_s21 = sshll.u32 %s369_s20, 4  ;;  %s371_s23 = smov 8   ;;  %s29_s21 = int_to_ptr.vmem [resolvable:$true] %s28_s21 }
   0x7   :  { %34 = dma.hbm_to_vmem [thread:$0]  %s27_s19, 10368, %s29_s21, [#allocation6], %s370_s22, %s370_s22, %s371_s23  }
   0x8   :  { %362 = dma.done.wait [#allocation3], 768  }
   0x9   :  { %363 = vsyncadd [#allocation3], 4294966528 }
   0xa   :  { %364 = dma.done.wait [#allocation6], 10368  }
   0xb   :  { %365 = vsyncadd [#allocation6], 4294956928  ;;  %v66_v0 = vld [vmem:[#allocation5 + $0x78] sm:$0xff]  ;;  %v65_v1 = vld [vmem:[#allocation5 + $0x70] sm:$0xff]  ;;  %vm138_vm0 = vcmask 64512   ;;  %s271_s27 = sshll.u32 %s409_s3, 4  ;;  %s272_s27 = int_to_ptr.hbm [resolvable:$true] %s271_s27 }
   0xc   :  { %142 = vmatpush.msra.mxu0 %v66_v0  ;;  %v64_v2 = vld [vmem:[#allocation5 + $0x68] sm:$0xff]  ;;  %v98_v3 = vld [vmem:[#allocation5 + $0x178] sm:$0xff]  ;;  %v63_v4 = vld [vmem:[#allocation5 + $0x60] sm:$0xff] }
   0xd   :  { %182 = vmatpush.msra.mxu2 %v98_v3  ;;  %v97_v5 = vld [vmem:[#allocation5 + $0x170] sm:$0xff]  ;;  %v114_v6 = vld [vmem:[#allocation5 + $0x1f8] sm:$0xff]  ;;  %v96_v8 = vld [vmem:[#allocation5 + $0x168] sm:$0xff] }
   0xe   :  { %143 = vmatpush.msra.mxu0 %v65_v1  ;;  %202 = vmatpush.msra.mxu3 %v114_v6  ;;  %v82_v7 = vld [vmem:[#allocation5 + $0xf8] sm:$0xff]  ;;  %v113_v10 = vld [vmem:[#allocation5 + $0x1f0] sm:$0xff]  ;;  %v95_v12 = vld [vmem:[#allocation5 + $0x160] sm:$0xff] }
   0xf   :  { %v62_v9 = vld [vmem:[#allocation5 + $0x58] sm:$0xff]  ;;  %183 = vmatpush.msra.mxu2 %v97_v5  ;;  %162 = vmatpush.msra.mxu1 %v82_v7  ;;  %v81_v11 = vld [vmem:[#allocation5 + $0xf0] sm:$0xff]  ;;  %v112_v13 = vld [vmem:[#allocation5 + $0x1e8] sm:$0xff] }
  0x10   :  { %144 = vmatpush.msra.mxu0 %v64_v2  ;;  %203 = vmatpush.msra.mxu3 %v113_v10  ;;  %v61_v14 = vld [vmem:[#allocation5 + $0x50] sm:$0xff]  ;;  %v80_v15 = vld [vmem:[#allocation5 + $0xe8] sm:$0xff]  ;;  %v111_v16 = vld [vmem:[#allocation5 + $0x1e0] sm:$0xff] }
  0x11   :  { %184 = vmatpush.msra.mxu2 %v96_v8  ;;  %163 = vmatpush.msra.mxu1 %v81_v11  ;;  %v94_v17 = vld [vmem:[#allocation5 + $0x158] sm:$0xff]  ;;  %v79_v18 = vld [vmem:[#allocation5 + $0xe0] sm:$0xff]  ;;  %v60_v19 = vld [vmem:[#allocation5 + $0x48] sm:$0xff] }
  0x12   :  { %145 = vmatpush.msra.mxu0 %v63_v4  ;;  %204 = vmatpush.msra.mxu3 %v112_v13  ;;  %v110_v20 = vld [vmem:[#allocation5 + $0x1d8] sm:$0xff]  ;;  %v93_v21 = vld [vmem:[#allocation5 + $0x150] sm:$0xff]  ;;  %v59_v23 = vld [vmem:[#allocation5 + $0x40] sm:$0xff] }
  0x13   :  { %185 = vmatpush.msra.mxu2 %v95_v12  ;;  %164 = vmatpush.msra.mxu1 %v80_v15  ;;  %v78_v22 = vld [vmem:[#allocation5 + $0xd8] sm:$0xff]  ;;  %v109_v24 = vld [vmem:[#allocation5 + $0x1d0] sm:$0xff]  ;;  %v92_v25 = vld [vmem:[#allocation5 + $0x148] sm:$0xff]  ;;  %v372_v12 = vmov 0  }
  0x14   :  { %146 = vmatpush.msra.mxu0 %v62_v9  ;;  %205 = vmatpush.msra.mxu3 %v111_v16  ;;  %v77_v26 = vld [vmem:[#allocation5 + $0xd0] sm:$0xff]  ;;  %v58_v27 = vld [vmem:[#allocation5 + $0x38] sm:$0xff]  ;;  %v108_v28 = vld [vmem:[#allocation5 + $0x1c8] sm:$0xff] }
  0x15   :  { %186 = vmatpush.msra.mxu2 %v94_v17  ;;  %165 = vmatpush.msra.mxu1 %v79_v18  ;;  %v91_v29 = vld [vmem:[#allocation5 + $0x140] sm:$0xff]  ;;  %v76_v30 = vld [vmem:[#allocation5 + $0xc8] sm:$0xff]  ;;  %v57_v31 = vld [vmem:[#allocation5 + $0x30] sm:$0xff] }
  0x16   :  { %147 = vmatpush.msra.mxu0 %v61_v14  ;;  %206 = vmatpush.msra.mxu3 %v110_v20  ;;  %v107_v32 = vld [vmem:[#allocation5 + $0x1c0] sm:$0xff]  ;;  %v90_v33 = vld [vmem:[#allocation5 + $0x138] sm:$0xff]  ;;  %v56_v35 = vld [vmem:[#allocation5 + $0x28] sm:$0xff] }
  0x17   :  { %187 = vmatpush.msra.mxu2 %v93_v21  ;;  %166 = vmatpush.msra.mxu1 %v78_v22  ;;  %v75_v34 = vld [vmem:[#allocation5 + $0xc0] sm:$0xff]  ;;  %v106_v36 = vld [vmem:[#allocation5 + $0x1b8] sm:$0xff]  ;;  %v89_v37 = vld [vmem:[#allocation5 + $0x130] sm:$0xff] }
  0x18   :  { %148 = vmatpush.msra.mxu0 %v60_v19  ;;  %207 = vmatpush.msra.mxu3 %v109_v24  ;;  %v74_v38 = vld [vmem:[#allocation5 + $0xb8] sm:$0xff]  ;;  %v55_v39 = vld [vmem:[#allocation5 + $0x20] sm:$0xff]  ;;  %v105_v40 = vld [vmem:[#allocation5 + $0x1b0] sm:$0xff] }
  0x19   :  { %188 = vmatpush.msra.mxu2 %v92_v25  ;;  %167 = vmatpush.msra.mxu1 %v77_v26  ;;  %v88_v41 = vld [vmem:[#allocation5 + $0x128] sm:$0xff]  ;;  %v73_v42 = vld [vmem:[#allocation5 + $0xb0] sm:$0xff]  ;;  %v54_v43 = vld [vmem:[#allocation5 + $0x18] sm:$0xff] }
  0x1a   :  { %149 = vmatpush.msra.mxu0 %v59_v23  ;;  %208 = vmatpush.msra.mxu3 %v108_v28  ;;  %v104_v44 = vld [vmem:[#allocation5 + $0x1a8] sm:$0xff]  ;;  %v87_v45 = vld [vmem:[#allocation5 + $0x120] sm:$0xff]  ;;  %v53_v47 = vld [vmem:[#allocation5 + $0x10] sm:$0xff] }
  0x1b   :  { %189 = vmatpush.msra.mxu2 %v91_v29  ;;  %168 = vmatpush.msra.mxu1 %v76_v30  ;;  %v72_v46 = vld [vmem:[#allocation5 + $0xa8] sm:$0xff]  ;;  %v103_v48 = vld [vmem:[#allocation5 + $0x1a0] sm:$0xff]  ;;  %v86_v49 = vld [vmem:[#allocation5 + $0x118] sm:$0xff] }
  0x1c   :  { %150 = vmatpush.msra.mxu0 %v58_v27  ;;  %209 = vmatpush.msra.mxu3 %v107_v32  ;;  %v71_v50 = vld [vmem:[#allocation5 + $0xa0] sm:$0xff]  ;;  %v52_v51 = vld [vmem:[#allocation5 + $0x8] sm:$0xff]  ;;  %v102_v52 = vld [vmem:[#allocation5 + $0x198] sm:$0xff] }
  0x1d   :  { %190 = vmatpush.msra.mxu2 %v90_v33  ;;  %169 = vmatpush.msra.mxu1 %v75_v34  ;;  %v85_v53 = vld [vmem:[#allocation5 + $0x110] sm:$0xff]  ;;  %v70_v54 = vld [vmem:[#allocation5 + $0x98] sm:$0xff]  ;;  %v51_v55 = vld [vmem:[#allocation5] sm:$0xff] }
  0x1e   :  { %151 = vmatpush.msra.mxu0 %v57_v31  ;;  %210 = vmatpush.msra.mxu3 %v106_v36  ;;  %v101_v56 = vld [vmem:[#allocation5 + $0x190] sm:$0xff]  ;;  %v130_v57 = vld [vmem:[#allocation5 + $0x278] sm:$0xff]  ;;  %v84_v58 = vld [vmem:[#allocation5 + $0x108] sm:$0xff] }
  0x1f   :  { %191 = vmatpush.msra.mxu2 %v89_v37  ;;  %170 = vmatpush.msra.mxu1 %v74_v38  ;;  %v69_v59 = vld [vmem:[#allocation5 + $0x90] sm:$0xff]  ;;  %v100_v60 = vld [vmem:[#allocation5 + $0x188] sm:$0xff]  ;;  %v83_v62 = vld [vmem:[#allocation5 + $0x100] sm:$0xff] }
  0x20   :  { %152 = vmatpush.msra.mxu0 %v56_v35  ;;  %211 = vmatpush.msra.mxu3 %v105_v40  ;;  %v129_v61 = vld [vmem:[#allocation5 + $0x270] sm:$0xff]  ;;  %v47_v63 = vld [vmem:[#allocation2 + $0x10] sm:$0xff]  ;;  %v68_v0 = vld [vmem:[#allocation5 + $0x88] sm:$0xff] }
  0x21   :  { %192 = vmatpush.msra.mxu2 %v88_v41  ;;  %171 = vmatpush.msra.mxu1 %v73_v42  ;;  %v128_v1 = vld [vmem:[#allocation5 + $0x268] sm:$0xff]  ;;  %v99_v2 = vld [vmem:[#allocation5 + $0x180] sm:$0xff]  ;;  %v45_v3 = vld [vmem:[#allocation2] sm:$0xff] }
  0x22   :  { %153 = vmatpush.msra.mxu0 %v55_v39  ;;  %212 = vmatpush.msra.mxu3 %v104_v44  ;;  %v48_v4 = vld [vmem:[#allocation2 + $0x18] sm:$0xff]  ;;  %v127_v5 = vld [vmem:[#allocation5 + $0x260] sm:$0xff]  ;;  %v46_v7 = vld [vmem:[#allocation2 + $0x8] sm:$0xff] }
  0x23   :  { %193 = vmatpush.msra.mxu2 %v87_v45  ;;  %172 = vmatpush.msra.mxu1 %v72_v46  ;;  %v67_v6 = vld [vmem:[#allocation5 + $0x80] sm:$0xff]  ;;  %v126_v8 = vld [vmem:[#allocation5 + $0x258] sm:$0xff]  ;;  %v132_v10 = vld [vmem:[%s408_s2] sm:$0xff]  ;;  %s373_s2 = smov [#allocation7]  }
  0x24   :  { %154 = vmatpush.msra.mxu0 %v54_v43  ;;  %213 = vmatpush.msra.mxu3 %v103_v48  ;;  %v131_v9 = vld [vmem:[#allocation5 + $0x280] sm:$0xff]  ;;  %v125_v11 = vld [vmem:[#allocation5 + $0x250] sm:$0xff]  ;;  %v124_v13 = vld [vmem:[#allocation5 + $0x248] sm:$0xff]  ;;  %s269_s24 = sshll.u32 %s373_s2, 4  ;;  %s270_s24 = int_to_ptr.vmem [resolvable:$true] %s269_s24 }
  0x25   :  { %194 = vmatpush.msra.mxu2 %v86_v49  ;;  %173 = vmatpush.msra.mxu1 %v71_v50  ;;  %v123_v14 = vld [vmem:[#allocation5 + $0x240] sm:$0xff]  ;;  %v50_v15 = vld [vmem:[#allocation2 + $0x28] sm:$0xff]  ;;  %v121_v17 = vld [vmem:[#allocation5 + $0x230] sm:$0xff] }
  0x26   :  { %155 = vmatpush.msra.mxu0 %v53_v47  ;;  %214 = vmatpush.msra.mxu3 %v102_v52  ;;  %v122_v16 = vld [vmem:[#allocation5 + $0x238] sm:$0xff]  ;;  %v120_v18 = vld [vmem:[#allocation5 + $0x228] sm:$0xff]  ;;  %v119_v19 = vld [vmem:[#allocation5 + $0x220] sm:$0xff] }
  0x27   :  { %195 = vmatpush.msra.mxu2 %v85_v53  ;;  %174 = vmatpush.msra.mxu1 %v70_v54  ;;  %v118_v20 = vld [vmem:[#allocation5 + $0x218] sm:$0xff]  ;;  %v117_v21 = vld [vmem:[#allocation5 + $0x210] sm:$0xff]  ;;  %v116_v22 = vld [vmem:[#allocation5 + $0x208] sm:$0xff] }
  0x28   :  { %156 = vmatpush.msra.mxu0 %v52_v51  ;;  %215 = vmatpush.msra.mxu3 %v101_v56  ;;  %v115_v23 = vld [vmem:[#allocation5 + $0x200] sm:$0xff]  ;;  %v49_v24 = vld [vmem:[#allocation2 + $0x20] sm:$0xff] }
  0x29   :  { %196 = vmatpush.msra.mxu2 %v84_v58  ;;  %175 = vmatpush.msra.mxu1 %v69_v59 }
  0x2a   :  { %157 = vmatpush.msra.mxu0 %v51_v55  ;;  %216 = vmatpush.msra.mxu3 %v100_v60 }
  0x2b   :  { %197 = vmatpush.msra.mxu2 %v83_v62  ;;  %176 = vmatpush.msra.mxu1 %v68_v0 }
  0x2c   :  { %222 = vmatpush.msrb.mxu0 %v130_v57  ;;  %198 = vmatmul.f32.vlgmr.msra.gmra.mxu2 %v47_v63 }
  0x2d   :  { %217 = vmatpush.msra.mxu3 %v99_v2  ;;  %158 = vmatmul.f32.vlgmr.msra.gmra.mxu0 %v45_v3 }
  0x2e   :  { %223 = vmatpush.msrb.mxu0 %v129_v61  ;;  %218 = vmatmul.f32.vlgmr.msra.gmra.mxu3 %v48_v4 }
  0x2f   :  { %177 = vmatpush.msra.mxu1 %v67_v6  ;;  %289 = vset.pattern.permute.xlu0 %v372_v12 }
  0x30   :  { %224 = vmatpush.msrb.mxu0 %v128_v1  ;;  %178 = vmatmul.f32.vlgmr.msra.gmra.mxu1 %v46_v7 }
  0x31   :  { %257 = vmatpush.msrb.mxu1 %v131_v9  ;;  %135 = vperm.xlu0 %289, %v132_v10  }
  0x32   :  { %225 = vmatpush.msrb.mxu0 %v127_v5 }
  0x34   :  { %226 = vmatpush.msrb.mxu0 %v126_v8 }
  0x36   :  { %227 = vmatpush.msrb.mxu0 %v125_v11 }
  0x38   :  { %228 = vmatpush.msrb.mxu0 %v124_v13  ;;  %282 = vmatmul.msk.f32.vlgmr.msrb.gmra.mxu1 %vm138_vm0, %v50_v15 }
  0x3a   :  { %229 = vmatpush.msrb.mxu0 %v123_v14 }
  0x3c   :  { %230 = vmatpush.msrb.mxu0 %v122_v16 }
  0x3e   :  { %231 = vmatpush.msrb.mxu0 %v121_v17 }
  0x40   :  { %232 = vmatpush.msrb.mxu0 %v120_v18 }
  0x42   :  { %233 = vmatpush.msrb.mxu0 %v119_v19 }
  0x44   :  { %234 = vmatpush.msrb.mxu0 %v118_v20 }
  0x46   :  { %235 = vmatpush.msrb.mxu0 %v117_v21 }
  0x48   :  { %236 = vmatpush.msrb.mxu0 %v116_v22 }
  0x4a   :  { %237 = vmatpush.msrb.mxu0 %v115_v23 }
  0x4b   :  { %238 = vmatmul.f32.vlgmr.msrb.gmra.mxu0 %v49_v24 }
  0xa3   :  { %v136_v25 = vpop.permute.xlu0 %135 }
  0xaa   :  { %v159_v26 = vpop.f32.mrf.mxu0 }
  0xab   :  { %v160_v27 = vadd.f32 %v159_v26, %v136_v25 }
  0xad   :  { %v179_v28 = vpop.f32.mrf.mxu1 }
  0xae   :  { %v180_v29 = vadd.f32 %v179_v28, %v160_v27 }
  0xaf   :  { %v199_v30 = vpop.f32.mrf.mxu2 }
  0xb0   :  { %v200_v31 = vadd.f32 %v199_v30, %v180_v29 }
  0xb1   :  { %v219_v32 = vpop.f32.mrf.mxu3 }
  0xb2   :  { %v220_v33 = vadd.f32 %v219_v32, %v200_v31 }
  0xb5   :  { %v259_v35 = vpop.f32.mrf.mxu1 }
  0xc8   :  { %v239_v34 = vpop.f32.mrf.mxu0 }
  0xc9   :  { %v240_v36 = vadd.f32 %v239_v34, %v220_v33 }
  0xcb   :  { %v260_v37 = vadd.f32 %v259_v35, %v240_v36 }
  0xcd   :  { %v262_v38 = vmax.f32 %v260_v37, 0.0 }
  0xcf   :  { %263 = vst [vmem:[#allocation7] sm:$0xff] %v262_v38 }
  0xd0   :  { %274 = dma.vmem_to_hbm [thread:$0]  %s270_s24, 128, %s272_s27, [#allocation4]  }
  0xd1   :  { %366 = dma.done.wait [#allocation4], 128  }
  0xd2   :  { %367 = vsyncadd [#allocation4], 4294967168 }
  0xd3   :  { %279 = vsyncpa [#allocation3], 1 }
  0xd4   :  { %280 = vsyncpa [#allocation6], 1 }
  0xd5   :  { %281 = vsyncpa [#allocation4], 1 }

</bundles_post_ra>
